<compile_context>
chip_gen: v7x
topology: tpu7x:2x2x1
jax: 0.10.0
libtpu: 0.0.40
codegen_flags: <defaults>
</compile_context>

<pallas_src>
import jax
import jax.numpy as jnp
from jax.experimental import pallas as pl
from jax.experimental.pallas import tpu as pltpu


def _round_up(x, m):
    return -(-x // m) * m


def _sublane_rows(dtype):
    # Packed sublane multiple: 8 for 4-byte, 16 for 2-byte, 32 for 1-byte dtypes.
    return max(8, 32 // jnp.dtype(dtype).itemsize)


def _tpu_vmem_bytes():
    try:
        return int(pltpu.get_tpu_info().vmem_capacity_bytes)
    except Exception:
        return 64 * 1024 * 1024  # conservative fallback (v7x per-core VMEM)


def _choose_tile_rows(num_rows, row_bytes, max_block_bytes, sublane,
                      min_block_bytes=2 * 1024 * 1024, max_rows=4096):
    """Pick the row-tile size: as big as the budget allows, sublane-aligned,
    but aiming for >= 4 grid steps (core balance on v7x) while keeping blocks
    above ~2 MiB so the ~0.35 us per-step cost stays amortized."""
    def rows_for(nbytes):
        return max(sublane, (nbytes // max(1, row_bytes)) // sublane * sublane)

    rows = rows_for(max_block_bytes)
    four_way = _round_up(pl.cdiv(num_rows, 4), sublane)
    rows = min(rows, max(four_way, rows_for(min_block_bytes)))
    rows = min(rows, max_rows)                       # bound (tm,1) out-block padding
    return min(rows, _round_up(num_rows, sublane))


def _row_sumsq_kernel(pred_ref, gt_ref, out_ref):
    # Cast AFTER load so bf16/fp16 inputs keep half the DMA traffic; square and
    # reduce over the spatial (lane) axis in f32.
    diff = pred_ref[...].astype(jnp.float32) - gt_ref[...].astype(jnp.float32)
    out_ref[...] = jnp.sum(diff * diff, axis=1, keepdims=True)   # (TM, 1)


def joints_mse_loss(output, target, target_weight=None, use_target_weight=True,
                    max_block_bytes=None):
    """output/target: (B, J, H, W) (or (B, J, P)); target_weight: (B, J, 1).
    Returns a scalar f32 loss matching the PyTorch JointsMSELoss above."""
    B, J = output.shape[0], output.shape[1]
    P = 1
    for d in output.shape[2:]:
        P *= d
    R = B * J

    pred = output.reshape(R, P)
    gt = target.reshape(R, P)

    itemsize = jnp.dtype(output.dtype).itemsize
    sublane = _sublane_rows(output.dtype)
    vmem_cap = _tpu_vmem_bytes()
    if max_block_bytes is None:
        # 2 inputs x 2 pipeline buffers must leave plenty of headroom even on
        # v7x's 64 MiB VMEM; v5e/v6e (128 MiB) also land on 8 MiB blocks.
        max_block_bytes = min(8 * 1024 * 1024, vmem_cap // 8)

    tm = _choose_tile_rows(R, P * itemsize, max_block_bytes, sublane)
    num_tiles = pl.cdiv(R, tm)

    block_bytes = tm * P * itemsize
    out_buf_bytes = tm * 128 * 4          # (tm,1) f32 out block is lane-padded in VMEM
    vmem_limit = max(32 << 20, 4 * block_bytes + 2 * out_buf_bytes + (8 << 20))
    vmem_limit = min(vmem_limit, vmem_cap - (8 << 20))
    vmem_limit = max(vmem_limit, 16 << 20)

    row_block = pl.BlockSpec((tm, P), lambda i: (i, 0))

    row_sums = pl.pallas_call(
        _row_sumsq_kernel,
        out_shape=jax.ShapeDtypeStruct((R, 1), jnp.float32),
        grid_spec=pltpu.PrefetchScalarGridSpec(
            num_scalar_prefetch=0,
            grid=(num_tiles,),
            in_specs=[row_block, row_block],
            out_specs=pl.BlockSpec((tm, 1), lambda i: (i, 0)),
        ),
        compiler_params=pltpu.CompilerParams(
            dimension_semantics=("parallel",),
            vmem_limit_bytes=int(vmem_limit),
        ),
    )(pred, gt)[:, 0]                                      # (R,) f32 per-row sums

    # Tiny O(R) epilogue in plain JAX: fold the target weight and shared scale.
    if use_target_weight:
        w2 = jnp.square(target_weight.reshape(R).astype(jnp.float32))
        total = jnp.sum(row_sums * w2)
    else:
        total = jnp.sum(row_sums)
    return total * (1.0 / float(B * P))


def _reference(output, target, target_weight, use_target_weight=True):
    # Plain-JAX mirror of the PyTorch per-joint loop (verification only).
    B, J = output.shape[0], output.shape[1]
    pred = output.reshape(B, J, -1).astype(jnp.float32)
    gt = target.reshape(B, J, -1).astype(jnp.float32)
    loss = 0.0
    for idx in range(J):
        hp = pred[:, idx, :]
        hg = gt[:, idx, :]
        if use_target_weight:
            w = target_weight[:, idx].astype(jnp.float32)   # (B, 1)
            hp = hp * w
            hg = hg * w
        loss = loss + jnp.mean((hp - hg) ** 2)
    return loss


if __name__ == "__main__":
    key = jax.random.PRNGKey(0)

    def _check(B, J, H, W, use_w, dtype=jnp.float32, rtol=1e-5, atol=1e-5, **kwargs):
        k1, k2, k3 = jax.random.split(jax.random.fold_in(key, B * 1000 + J), 3)
        output = jax.random.normal(k1, (B, J, H, W), dtype=dtype)
        target = jax.random.normal(k2, (B, J, H, W), dtype=dtype)
        target_weight = jax.random.uniform(k3, (B, J, 1), dtype=jnp.float32)
        loss = joints_mse_loss(output, target, target_weight,
                               use_target_weight=use_w, **kwargs)
        loss = jax.block_until_ready(loss)
        ref = _reference(output, target, target_weight, use_target_weight=use_w)
        assert jnp.allclose(loss, ref, rtol=rtol, atol=atol), (B, J, H, W, loss, ref)

    # Base shapes (single tile), weighted and unweighted paths.
    _check(2, 4, 16, 16, True)
    _check(2, 4, 16, 16, False)
    # Multi-tile path: tiny block budget -> tm=8, 4 grid steps, parallel axis.
    _check(2, 16, 16, 16, True, max_block_bytes=8 * 256 * 4)
    # Ragged tail across tiles: R=18, tm=8 -> 3 tiles, last one only 2 valid rows
    # (exercises Pallas partial-block clipping with no HBM padding).
    _check(2, 9, 16, 16, True, max_block_bytes=8 * 256 * 4)
    # Ragged single tile (R=6 inside an 8-row block).
    _check(2, 3, 16, 16, True)
    # bf16 heatmaps (half the HBM traffic); kernel accumulates in f32.
    _check(2, 4, 16, 16, True, dtype=jnp.bfloat16, rtol=1e-4, atol=1e-4)

    print("KERNEL_OK")
</pallas_src>

<mosaic_0001>
module attributes {stable_mosaic.version = 11 : i64} {
  func.func @_row_sumsq_kernel(%arg0: i32, %arg1: memref<8x256xf32, #tpu.memory_space<vmem>>, %arg2: memref<8x256xf32, #tpu.memory_space<vmem>>, %arg3: memref<8x1xf32, #tpu.memory_space<vmem>>) attributes {dimension_semantics = [#tpu.dimension_semantics<parallel>], iteration_bounds = array<i64: 1>, scalar_prefetch = 0 : i64, scratch_operands = 0 : i64, tpu.core_type = #tpu.core_type<tc>, window_params = [{transform_indices = @transform_0, window_bounds = array<i64: 8, 256>}, {transform_indices = @transform_1, window_bounds = array<i64: 8, 256>}, {transform_indices = @transform_2, window_bounds = array<i64: 8, 1>}]} {
    %c0 = arith.constant 0 : index
    %c0_0 = arith.constant 0 : index
    %0 = vector.load %arg1[%c0, %c0_0] : memref<8x256xf32, #tpu.memory_space<vmem>>, vector<8x256xf32>
    %c0_1 = arith.constant 0 : index
    %c0_2 = arith.constant 0 : index
    %1 = vector.load %arg2[%c0_1, %c0_2] : memref<8x256xf32, #tpu.memory_space<vmem>>, vector<8x256xf32>
    %2 = arith.subf %0, %1 : vector<8x256xf32>
    %3 = arith.mulf %2, %2 : vector<8x256xf32>
    %cst = arith.constant dense<0.000000e+00> : vector<8xf32>
    %4 = vector.multi_reduction <add>, %3, %cst [1] : vector<8x256xf32> to vector<8xf32>
    %5 = vector.shape_cast %4 : vector<8xf32> to vector<8x1xf32>
    %c0_3 = arith.constant 0 : index
    %c0_4 = arith.constant 0 : index
    %6 = vector.load %arg3[%c0_3, %c0_4] : memref<8x1xf32, #tpu.memory_space<vmem>>, vector<8x1xf32>
    tpu.vector_store %arg3[%c0_3, %c0_4], %5 {strides = array<i32>} : memref<8x1xf32, #tpu.memory_space<vmem>>, vector<8x1xf32>,
    return
  }
  func.func @transform_0(%arg0: i32) -> (i32, i32) {
    %c0_i32 = arith.constant 0 : i32
    %c0_i32_0 = arith.constant 0 : i32
    return %arg0, %c0_i32 : i32, i32
  }
  func.func @transform_1(%arg0: i32) -> (i32, i32) {
    %c0_i32 = arith.constant 0 : i32
    %c0_i32_0 = arith.constant 0 : i32
    return %arg0, %c0_i32 : i32, i32
  }
  func.func @transform_2(%arg0: i32) -> (i32, i32) {
    %c0_i32 = arith.constant 0 : i32
    %c0_i32_0 = arith.constant 0 : i32
    return %arg0, %c0_i32 : i32, i32
  }
}

</mosaic_0001>

<bundles_post_ra>
// kernel: tpu_custom_call.1
= control target key start
LH: loop header
LB: loop body
LE: loop exit
PB: predicated region body
PF: predicated region fallthrough
CT: control target
= control target key end

     0   :  { %7 = vsyncpa [#allocation3], 0  ;;  %s148_s0 = inlined_call_operand.hbm [shape: f32[8,256], index: 0, kind: input, shape index: {}]   ;;  %s149_s1 = inlined_call_operand.hbm [shape: f32[8,256], index: 1, kind: input, shape index: {}]   ;;  %s150_s2 = inlined_call_operand.vmem [shape: f32[8,1], index: 2, kind: output, shape index: {}]  }
   0x1   :  { %8 = vsyncpa [#allocation5], 0  ;;  %s104_s9 = smov [#allocation2]   ;;  %s105_s11 = smov [#allocation4]  }
   0x2   :  { %s15_s10 = sshll.u32 %s104_s9, 4  ;;  %s25_s12 = sshll.u32 %s105_s11, 4  ;;  %s16_s10 = int_to_ptr.vmem [resolvable:$true] %s15_s10  ;;  %s26_s12 = int_to_ptr.vmem [resolvable:$true] %s25_s12 }
   0x3   :  { %s56_s15 = scalar_lea.hbm %s148_s0, 256 }
   0x4   :  { %p57_p0 = scmp.ne.s32.totalorder %s148_s0, %s56_s15  ;;  %p60_p1 = scmp.lt.u32.totalorder %s56_s15, %s148_s0 }
   0x6   :  { %p62_p2 = pnand %p60_p1, %p57_p0 }
   0x8   :  { %65 = shalt.err (!%p62_p2)
}
   0x9   :  { %s66_s20 = scalar_lea.vmem %s16_s10, 256  ;;  %p71_p4 = scmp.lt.s32.totalorder %s16_s10, %s16_s10 }
   0xa   :  { %p67_p3 = scmp.ne.s32.totalorder %s16_s10, %s66_s20  ;;  %p72_p5 = scmp.lt.s32.totalorder %s66_s20, %s66_s20 }
   0xc   :  { %p73_p6 = por %p72_p5, %p71_p4 }
   0xe   :  { %p74_p7 = pnand %p73_p6, %p67_p3 }
  0x10   :  { %77 = shalt.err (!%p74_p7)
}
  0x11   :  { %18 = dma.hbm_to_vmem [thread:$0]  %s148_s0, 256, %s16_s10, [#allocation3]  }
  0x12   :  { %s78_s25 = scalar_lea.hbm %s149_s1, 256 }
  0x13   :  { %p79_p8 = scmp.ne.s32.totalorder %s149_s1, %s78_s25  ;;  %p82_p9 = scmp.lt.u32.totalorder %s78_s25, %s149_s1 }
  0x15   :  { %p84_p10 = pnand %p82_p9, %p79_p8 }
  0x17   :  { %87 = shalt.err (!%p84_p10)
}
  0x18   :  { %s88_s30 = scalar_lea.vmem %s26_s12, 256  ;;  %p93_p12 = scmp.lt.s32.totalorder %s26_s12, %s26_s12 }
  0x19   :  { %p89_p11 = scmp.ne.s32.totalorder %s26_s12, %s88_s30  ;;  %p94_p13 = scmp.lt.s32.totalorder %s88_s30, %s88_s30 }
  0x1b   :  { %p95_p0 = por %p94_p13, %p93_p12 }
  0x1d   :  { %p96_p1 = pnand %p95_p0, %p89_p11 }
  0x1f   :  { %99 = shalt.err (!%p96_p1)
}
  0x20   :  { %28 = dma.hbm_to_vmem [thread:$0]  %s149_s1, 256, %s26_s12, [#allocation5]  }
  0x21   :  { %100 = dma.done.wait [#allocation3], 256  }
  0x22   :  { %101 = vsyncadd [#allocation3], 4294967040 }
  0x23   :  { %102 = dma.done.wait [#allocation5], 256  }
  0x24   :  { %103 = vsyncadd [#allocation5], 4294967040  ;;  %v35_v0 = vld [vmem:[#allocation2] sm:$0xff]  ;;  %v36_v1 = vld [vmem:[#allocation2 + $0x8] sm:$0xff]  ;;  %vm46_vm0 = vcmask 7168  }
  0x25   :  { %v37_v2 = vld [vmem:[#allocation4] sm:$0xff]  ;;  %v38_v3 = vld [vmem:[#allocation4 + $0x8] sm:$0xff] }
  0x26   :  { %v39_v4 = vsub.f32 %v35_v0, %v37_v2  ;;  %v40_v5 = vsub.f32 %v36_v1, %v38_v3 }
  0x28   :  { %v41_v6 = vmul.f32 %v39_v4, %v39_v4  ;;  %v42_v7 = vmul.f32 %v40_v5, %v40_v5 }
  0x2a   :  { %v43_v8 = vadd.f32 %v42_v7, %v41_v6 }
  0x2c   :  { %44 = vadd.xlane.f32.xlu0 %v43_v8 }
  0xb9   :  { %v45_v9 = vpop.xlane.xlu0 %44 }
  0xba   :  { %47 = vst.msk [vmem:[%s150_s2] sm:$0xff] %vm46_vm0, %v45_v9 }
  0xbb   :  { %52 = vsyncpa [#allocation3], 1 }
  0xbc   :  { %53 = vsyncpa [#allocation5], 1 }

</bundles_post_ra>
